<compile_context>
chip_gen: v6e
topology: v6e:2x2x1
jax: 0.10.0
libtpu: 0.0.40
codegen_flags: <defaults>
</compile_context>

<pallas_src>
import functools

import jax
import jax.numpy as jnp
from jax import lax
from jax.experimental import pallas as pl
from jax.experimental.pallas import tpu as pltpu

LANE = 128
_DEFAULT_SCOPED_VMEM = 32 * 1024 * 1024


def _round_up(x, m):
    return (x + m - 1) // m * m


def _pad_last(a, to):
    pad = to - a.shape[-1]
    if pad == 0:
        return a
    cfg = [(0, 0)] * (a.ndim - 1) + [(0, pad)]
    return jnp.pad(a, cfg)


# ----------------------------- Pallas kernels ------------------------------


def _project_kernel(x_ref, w_ref, attl_ref, xp_ref, al_ref):
    """xp = x @ W (bf16 MXU, f32 accum); also emits hoisted a_l = <xp, att_l>."""
    xp = jnp.dot(x_ref[...], w_ref[...], preferred_element_type=jnp.float32)
    xp_ref[...] = xp.astype(xp_ref.dtype)                       # bf16 feature store
    # Source-side attention score, hoisted out of the attention grid.
    # VPU reduce (not a 1-column MXU matmul).
    al_ref[...] = jnp.sum(xp * attl_ref[...], axis=-1, keepdims=True)


def project(x, w, att_l, *, tm):
    N, cin = x.shape
    hp = w.shape[1]
    return pl.pallas_call(
        _project_kernel,
        out_shape=(jax.ShapeDtypeStruct((N, hp), jnp.bfloat16),
                   jax.ShapeDtypeStruct((N, 1), jnp.float32)),
        grid_spec=pltpu.PrefetchScalarGridSpec(
            num_scalar_prefetch=0,
            grid=(N // tm,),
            in_specs=[
                pl.BlockSpec((tm, cin), lambda i: (i, 0)),
                pl.BlockSpec((cin, hp), lambda i: (0, 0)),
                pl.BlockSpec((1, hp), lambda i: (0, 0)),
            ],
            out_specs=(pl.BlockSpec((tm, hp), lambda i: (i, 0)),
                       pl.BlockSpec((tm, 1), lambda i: (i, 0))),
        ),
        compiler_params=pltpu.CompilerParams(
            dimension_semantics=("parallel",)),
    )(x, w, att_l)


def _attn_kernel(xp_ref, al_ref, adj_ref, attr_ref, bias_ref, o_ref, *,
                 tm, negative_slope, apply_relu):
    row0 = pl.multiple_of(pl.program_id(0) * tm, tm)
    xp_s = xp_ref[...]                                  # (N, Hp) bf16, resident
    xp_t = xp_ref[pl.ds(row0, tm), :]                   # (tm, Hp) bf16 target tile
    a_l = al_ref[...]                                   # (1, N)  f32 (hoisted)

    # MX gate logits <xp_i, xp_j>: contract feature dim of both operands
    # directly -> no in-kernel transpose of the source block.
    logits = lax.dot_general(xp_t, xp_s, (((1,), (1,)), ((), ())),
                             preferred_element_type=jnp.float32)      # (tm, N)
    a_r = jnp.sum(xp_t.astype(jnp.float32) * attr_ref[...], axis=-1,
                  keepdims=True)                                      # (tm, 1)

    e = (a_r + a_l) * jax.nn.sigmoid(logits)
    e = jnp.where(e > 0, e, negative_slope * e)                       # leaky_relu

    mask = adj_ref[...].astype(jnp.float32) > 0.5
    e = jnp.where(mask, e, -1e30)              # finite mask value (no inf-inf NaN)
    m = jnp.max(e, axis=-1, keepdims=True)
    p = jnp.where(mask, jnp.exp(e - m), 0.0)
    denom = jnp.maximum(jnp.sum(p, axis=-1, keepdims=True), 1e-20)
    alpha = p * pl.reciprocal(denom, approx=True)                     # EUP divide

    out = jnp.dot(alpha.astype(xp_s.dtype), xp_s,
                  preferred_element_type=jnp.float32) + bias_ref[...]
    if apply_relu:
        out = jnp.maximum(out, 0.0)
    o_ref[...] = out.astype(o_ref.dtype)


def supergat_attn(xp, al_row, adj, att_r, bias, *, tm, apply_relu, out_dtype,
                  negative_slope=0.2):
    N, hp = xp.shape
    kern = functools.partial(_attn_kernel, tm=tm,
                             negative_slope=negative_slope,
                             apply_relu=apply_relu)
    # VMEM estimate: resident xp + double-buffered adj tile + output tile + misc.
    est = (2 * N * hp * 2 + 2 * tm * N * 2 + 2 * tm * hp * 4
           + 2 * N * 4 + 4 * hp * 4 + (1 << 20))
    vmem_limit = None if est <= _DEFAULT_SCOPED_VMEM else int(min(est, 96 << 20))
    return pl.pallas_call(
        kern,
        out_shape=jax.ShapeDtypeStruct((N, hp), out_dtype),
        grid_spec=pltpu.PrefetchScalarGridSpec(
            num_scalar_prefetch=0,
            grid=(N // tm,),
            in_specs=[
                pl.BlockSpec((N, hp), lambda i: (0, 0)),   # xp (all sources), resident
                pl.BlockSpec((1, N), lambda i: (0, 0)),    # hoisted a_l row
                pl.BlockSpec((tm, N), lambda i: (i, 0)),   # adjacency rows (bf16)
                pl.BlockSpec((1, hp), lambda i: (0, 0)),   # att_r
                pl.BlockSpec((1, hp), lambda i: (0, 0)),   # bias
            ],
            out_specs=pl.BlockSpec((tm, hp), lambda i: (i, 0)),
        ),
        compiler_params=pltpu.CompilerParams(
            dimension_semantics=("parallel",),
            vmem_limit_bytes=vmem_limit),
    )(xp, al_row, adj, att_r, bias)


# ------------------------------ JAX glue ------------------------------------


def build_adj(edge_index, num_nodes):
    """Dense [target, source] mask; PyG default: drop self-loops then add them."""
    src, dst = edge_index[0], edge_index[1]
    not_self = (src != dst).astype(jnp.float32)
    adj = jnp.zeros((num_nodes, num_nodes), jnp.float32)
    adj = adj.at[dst, src].set(not_self)
    adj = adj + jnp.eye(num_nodes, dtype=jnp.float32)
    return jnp.minimum(adj, 1.0)


def _glorot(key, shape):
    fan_in, fan_out = shape[0], shape[-1]
    limit = jnp.sqrt(6.0 / (fan_in + fan_out))
    return jax.random.uniform(key, shape, jnp.float32, -limit, limit)


def init_params(key, d_in, h, L):
    """Layer dims: (d_in->h), (h->h) x (L-2), (h->1); all padded to 128 lanes."""
    dims = [(d_in, h)] + [(h, h)] * (L - 2) + [(h, 1)]
    cin_pads = [_round_up(d_in, LANE)] + [_round_up(h, LANE)] * (L - 1)
    params = []
    for (cin, cout), cin_pad in zip(dims, cin_pads):
        cout_pad = _round_up(cout, LANE)
        key, kw, kl, kr, kb = jax.random.split(key, 5)
        w = _glorot(kw, (cin, cout))
        w_pad = jnp.zeros((cin_pad, cout_pad), jnp.float32).at[:cin, :cout].set(w)
        params.append({
            "w": w_pad.astype(jnp.bfloat16),                        # bf16 MXU operand
            "att_l": _pad_last(_glorot(kl, (1, cout)), cout_pad),
            "att_r": _pad_last(_glorot(kr, (1, cout)), cout_pad),
            "bias": _pad_last(0.01 * jax.random.normal(kb, (1, cout), jnp.float32),
                              cout_pad),
            "c_out": cout,
        })
    return params


def multilayer_supergat_forward(params, x, adj, *, tm=256):
    N = x.shape[0]
    tm = min(tm, N)
    assert N % tm == 0 and tm % 8 == 0
    h = _pad_last(x, _round_up(x.shape[1], LANE)).astype(jnp.bfloat16)
    adj_bf16 = adj.astype(jnp.bfloat16)                 # halves the O(N^2) stream
    n_layers = len(params)
    for li, p in enumerate(params):
        last = (li == n_layers - 1)
        xp, al = project(h, p["w"], p["att_l"], tm=tm)
        al_row = al.reshape(1, N)                       # (N,1) -> (1,N), tiny XLA op
        h = supergat_attn(xp, al_row, adj_bf16, p["att_r"], p["bias"],
                          tm=tm, apply_relu=not last,
                          out_dtype=jnp.float32 if last else jnp.bfloat16)
    return h[:, :params[-1]["c_out"]]                   # drop lane padding of C_out


# --------------------------------- main --------------------------------------


if __name__ == "__main__":
    N, D_in, H, L = 16, 8, 32, 3
    TM = 256  # clamped to N for this small example

    key = jax.random.PRNGKey(0)
    kx, kp = jax.random.split(key)

    x = jax.random.normal(kx, (N, D_in), jnp.float32)

    # deterministic bidirectional ring graph (no duplicate edges)
    idx = jnp.arange(N)
    src = jnp.concatenate([idx, idx])
    dst = jnp.concatenate([(idx + 1) % N, (idx - 1) % N])
    edge_index = jnp.stack([src, dst]).astype(jnp.int32)   # [2, 2N]

    adj = build_adj(edge_index, N)
    params = init_params(kp, D_in, H, L)

    out = multilayer_supergat_forward(params, x, adj, tm=TM)   # [N, 1]
    out = jax.block_until_ready(out)
    assert out.shape == (N, 1) and bool(jnp.all(jnp.isfinite(out)))
    print("KERNEL_OK")
</pallas_src>

<mosaic_0001>
module attributes {stable_mosaic.version = 11 : i64} {
  func.func @_project_kernel(%arg0: i32, %arg1: memref<16x128xbf16, #tpu.memory_space<vmem>>, %arg2: memref<128x128xbf16, #tpu.memory_space<vmem>>, %arg3: memref<1x128xf32, #tpu.memory_space<vmem>>, %arg4: memref<16x128xbf16, #tpu.memory_space<vmem>>, %arg5: memref<16x1xf32, #tpu.memory_space<vmem>>) attributes {dimension_semantics = [#tpu.dimension_semantics<parallel>], iteration_bounds = array<i64: 1>, scalar_prefetch = 0 : i64, scratch_operands = 0 : i64, tpu.core_type = #tpu.core_type<tc>, window_params = [{transform_indices = @transform_0, window_bounds = array<i64: 16, 128>}, {pipeline_mode = #tpu.pipeline_mode<synchronous>, transform_indices = @transform_1, window_bounds = array<i64: 128, 128>}, {pipeline_mode = #tpu.pipeline_mode<synchronous>, transform_indices = @transform_2, window_bounds = array<i64: 1, 128>}, {transform_indices = @transform_3, window_bounds = array<i64: 16, 128>}, {transform_indices = @transform_4, window_bounds = array<i64: 16, 1>}]} {
    %c0 = arith.constant 0 : index
    %c0_0 = arith.constant 0 : index
    %0 = vector.load %arg1[%c0, %c0_0] : memref<16x128xbf16, #tpu.memory_space<vmem>>, vector<16x128xbf16>
    %c0_1 = arith.constant 0 : index
    %c0_2 = arith.constant 0 : index
    %1 = vector.load %arg2[%c0_1, %c0_2] : memref<128x128xbf16, #tpu.memory_space<vmem>>, vector<128x128xbf16>
    %cst = arith.constant dense<0.000000e+00> : vector<16x128xf32>
    %2 = tpu.matmul %0, %1, %cst {dimension_numbers = #tpu.dot_dimension_numbers<[1], [0], [0], [1], [0, 0, 1, 1], [], []>} : vector<16x128xbf16>, vector<128x128xbf16>, vector<16x128xf32> -> vector<16x128xf32>
    %3 = arith.truncf %2 : vector<16x128xf32> to vector<16x128xbf16>
    %c0_3 = arith.constant 0 : index
    %c0_4 = arith.constant 0 : index
    %4 = vector.load %arg4[%c0_3, %c0_4] : memref<16x128xbf16, #tpu.memory_space<vmem>>, vector<16x128xbf16>
    tpu.vector_store %arg4[%c0_3, %c0_4], %3 {strides = array<i32>} : memref<16x128xbf16, #tpu.memory_space<vmem>>, vector<16x128xbf16>,
    %c0_5 = arith.constant 0 : index
    %c0_6 = arith.constant 0 : index
    %5 = vector.load %arg3[%c0_5, %c0_6] : memref<1x128xf32, #tpu.memory_space<vmem>>, vector<1x128xf32>
    %6 = vector.broadcast %5 : vector<1x128xf32> to vector<16x128xf32>
    %7 = arith.mulf %2, %6 : vector<16x128xf32>
    %cst_7 = arith.constant dense<0.000000e+00> : vector<16xf32>
    %8 = vector.multi_reduction <add>, %7, %cst_7 [1] : vector<16x128xf32> to vector<16xf32>
    %9 = vector.shape_cast %8 : vector<16xf32> to vector<16x1xf32>
    %c0_8 = arith.constant 0 : index
    %c0_9 = arith.constant 0 : index
    %10 = vector.load %arg5[%c0_8, %c0_9] : memref<16x1xf32, #tpu.memory_space<vmem>>, vector<16x1xf32>
    tpu.vector_store %arg5[%c0_8, %c0_9], %9 {strides = array<i32>} : memref<16x1xf32, #tpu.memory_space<vmem>>, vector<16x1xf32>,
    return
  }
  func.func @transform_0(%arg0: i32) -> (i32, i32) {
    %c0_i32 = arith.constant 0 : i32
    %c0_i32_0 = arith.constant 0 : i32
    return %arg0, %c0_i32 : i32, i32
  }
  func.func @transform_1(%arg0: i32) -> (i32, i32) {
    %c0_i32 = arith.constant 0 : i32
    %c0_i32_0 = arith.constant 0 : i32
    %c0_i32_1 = arith.constant 0 : i32
    return %c0_i32, %c0_i32_0 : i32, i32
  }
  func.func @transform_2(%arg0: i32) -> (i32, i32) {
    %c0_i32 = arith.constant 0 : i32
    %c0_i32_0 = arith.constant 0 : i32
    %c0_i32_1 = arith.constant 0 : i32
    return %c0_i32, %c0_i32_0 : i32, i32
  }
  func.func @transform_3(%arg0: i32) -> (i32, i32) {
    %c0_i32 = arith.constant 0 : i32
    %c0_i32_0 = arith.constant 0 : i32
    return %arg0, %c0_i32 : i32, i32
  }
  func.func @transform_4(%arg0: i32) -> (i32, i32) {
    %c0_i32 = arith.constant 0 : i32
    %c0_i32_0 = arith.constant 0 : i32
    return %arg0, %c0_i32 : i32, i32
  }
}

</mosaic_0001>

<bundles_post_ra>
// kernel: tpu_custom_call.1
= control target key start
LH: loop header
LB: loop body
LE: loop exit
PB: predicated region body
PF: predicated region fallthrough
CT: control target
= control target key end

     0   :  { %10 = vsyncpa [#allocation3], 0  ;;  %s396_s0 = inlined_call_operand.hbm [shape: bf16[16,128], index: 0, kind: input, shape index: {}]   ;;  %s397_s1 = inlined_call_operand.hbm [shape: bf16[128,128], index: 1, kind: input, shape index: {}]   ;;  %s398_s2 = inlined_call_operand.vmem [shape: f32[1,128], index: 2, kind: input, shape index: {}]   ;;  %s399_s3 = inlined_call_operand.hbm [shape: bf16[16,128], index: 3, kind: output, shape index: {0}]   ;;  %s400_s4 = inlined_call_operand.vmem [shape: f32[16,1], index: 4, kind: output, shape index: {1}]  }
   0x1   :  { %11 = vsyncpa [#allocation6], 0 }
   0x2   :  { %12 = vsyncpa [#allocation4], 0  ;;  %s337_s15 = smov [#allocation2]  }
   0x3   :  { %s18_s16 = sshll.u32 %s337_s15, 4  ;;  %s19_s16 = int_to_ptr.vmem [resolvable:$true] %s18_s16 }
   0x4   :  { %s279_s17 = scalar_lea.vmem %s19_s16, 128  ;;  %p284_p1 = scmp.lt.s32.totalorder %s19_s16, %s19_s16 }
   0x5   :  { %p280_p0 = scmp.ne.s32.totalorder %s19_s16, %s279_s17  ;;  %p285_p2 = scmp.lt.s32.totalorder %s279_s17, %s279_s17 }
   0x7   :  { %p286_p3 = por %p285_p2, %p284_p1 }
   0x9   :  { %p287_p4 = pnand %p286_p3, %p280_p0 }
   0xb   :  { %290 = shalt.err (!%p287_p4)
}
   0xc   :  { %s338_s18 = smov 64   ;;  %s339_s19 = smov 4  }
   0xd   :  { %24 = dma.hbm_to_vmem [thread:$0]  %s396_s0, 128, %s19_s16, [#allocation3], %s338_s18, %s338_s18, %s339_s19  }
   0xe   :  { %s340_s22 = smov [#allocation5]  }
   0xf   :  { %s30_s23 = sshll.u32 %s340_s22, 4  ;;  %s31_s23 = int_to_ptr.vmem [resolvable:$true] %s30_s23 }
  0x10   :  { %s299_s24 = scalar_lea.vmem %s31_s23, 1024  ;;  %p304_p6 = scmp.lt.s32.totalorder %s31_s23, %s31_s23 }
  0x11   :  { %p300_p5 = scmp.ne.s32.totalorder %s31_s23, %s299_s24  ;;  %p305_p7 = scmp.lt.s32.totalorder %s299_s24, %s299_s24 }
  0x13   :  { %p306_p8 = por %p305_p7, %p304_p6 }
  0x15   :  { %p307_p9 = pnand %p306_p8, %p300_p5 }
  0x17   :  { %310 = shalt.err (!%p307_p9)
}
  0x18   :  { %36 = dma.hbm_to_vmem [thread:$0]  %s397_s1, 1024, %s31_s23, [#allocation6], %s338_s18, %s338_s18, %s339_s19  }
  0x19   :  { %331 = dma.done.wait [#allocation3], 128  }
  0x1a   :  { %332 = vsyncadd [#allocation3], 4294967168 }
  0x1b   :  { %333 = dma.done.wait [#allocation6], 1024  }
  0x1c   :  { %334 = vsyncadd [#allocation6], 4294966272  ;;  %v341_v0 = vmov 0.0   ;;  %vm342_vm0 = vmmov 0   ;;  %v262_v1 = vld [vmem:[#allocation5 + $0x38] sm:$0xff]   ;;  %v263_v2 = vld [vmem:[#allocation5 + $0x30] sm:$0xff]  }
  0x1d   :  { %235 = vmatprep.subr.bf16.mxu0 %v341_v0  ;;  %251 = vmatprep.mubr.msk.bf16.mxu0 %vm342_vm0, %v341_v0  ;;  %v264_v3 = vld [vmem:[#allocation5 + $0x28] sm:$0xff]   ;;  %v265_v4 = vld [vmem:[#allocation5 + $0x20] sm:$0xff]   ;;  %v266_v5 = vld [vmem:[#allocation5 + $0x18] sm:$0xff]   ;;  %s343_s27 = smov [#allocation7]  }
  0x1e   :  { %236 = vmatpush3.bf16.msra.mxu0 %v262_v1  ;;  %v267_v6 = vld [vmem:[#allocation5 + $0x10] sm:$0xff]   ;;  %v268_v7 = vld [vmem:[#allocation5 + $0x8] sm:$0xff]   ;;  %v269_v8 = vld [vmem:[#allocation5] sm:$0xff]   ;;  %s190_s28 = sshll.u32 %s343_s27, 4  ;;  %s191_s28 = int_to_ptr.vmem [resolvable:$true] %s190_s28 }
  0x1f   :  { %237 = vmatprep.subr.bf16.mxu0 %v341_v0  ;;  %v270_v9 = vld [vmem:[#allocation2] sm:$0xff]   ;;  %s311_s29 = scalar_lea.vmem %s191_s28, 128  ;;  %p316_p11 = scmp.lt.s32.totalorder %s191_s28, %s191_s28 }
  0x20   :  { %v218_v10 = vld [vmem:[%s398_s2] ss:$0 sm:$0xff]  ;;  %p312_p10 = scmp.ne.s32.totalorder %s191_s28, %s311_s29  ;;  %p317_p12 = scmp.lt.s32.totalorder %s311_s29, %s311_s29 }
  0x22   :  { %238 = vmatpush3.bf16.msra.mxu0 %v263_v2  ;;  %p318_p13 = por %p317_p12, %p316_p11 }
  0x23   :  { %239 = vmatprep.subr.bf16.mxu0 %v341_v0 }
  0x24   :  { %p319_p0 = pnand %p318_p13, %p312_p10 }
  0x26   :  { %240 = vmatpush3.bf16.msra.mxu0 %v264_v3 }
  0x27   :  { %241 = vmatprep.subr.bf16.mxu0 %v341_v0 }
  0x2a   :  { %242 = vmatpush3.bf16.msra.mxu0 %v265_v4 }
  0x2b   :  { %243 = vmatprep.subr.bf16.mxu0 %v341_v0 }
  0x2e   :  { %244 = vmatpush3.bf16.msra.mxu0 %v266_v5 }
  0x2f   :  { %245 = vmatprep.subr.bf16.mxu0 %v341_v0 }
  0x32   :  { %246 = vmatpush3.bf16.msra.mxu0 %v267_v6 }
  0x33   :  { %247 = vmatprep.subr.bf16.mxu0 %v341_v0 }
  0x36   :  { %248 = vmatpush3.bf16.msra.mxu0 %v268_v7 }
  0x37   :  { %249 = vmatprep.subr.bf16.mxu0 %v341_v0 }
  0x3a   :  { %250 = vmatpush3.bf16.msra.mxu0 %v269_v8 }
  0x3d   :  { %252 = vmatmul.mubr.bf16.vlgmr.msra.gmra.mxu0 %v270_v9 }
  0xfd   :  { %v152_v11 = vpop.f32.mrf.mxu0 }
  0xfe   :  { %v176_v12 = vmul.f32 %v218_v10, %v152_v11 }
  0xff   :  { %v253_v13 = vpop.f32.mrf.mxu0 }
 0x100   :  { %178 = vadd.xlane.f32.xlu0 %v176_v12 }
 0x101   :  { %v155_v14 = vpop.f32.mrf.mxu0 }
 0x102   :  { %v224_v15 = vpack.c.bf16 %v155_v14, %v152_v11  ;;  %v177_v16 = vmul.f32 %v218_v10, %v155_v14 }
 0x103   :  { %v254_v17 = vpop.f32.mrf.mxu0 }
 0x104   :  { %225 = vst [vmem:[#allocation7] sm:$0xff] %v224_v15   ;;  %180 = vadd.xlane.f32.xlu0 %v177_v16 }
 0x105   :  { %322 = shalt.err (!%p319_p0)
}
 0x106   :  { %196 = dma.vmem_to_hbm [thread:$0]  %s191_s28, 128, %s399_s3, [#allocation4], %s338_s18, %s338_s18, %s339_s19   ;;  %vm182_vm1 = vcmask 7168  }
 0x189   :  { %v179_v18 = vpop.xlane.xlu0 %178 }
 0x18a   :  { %183 = vst.msk [vmem:[%s400_s4] sm:$0xff] %vm182_vm1, %v179_v18 }
 0x18d   :  { %v181_v19 = vpop.xlane.xlu0 %180 }
 0x18e   :  { %184 = vst.msk [vmem:[%s400_s4 + $0x8] sm:$0xff] %vm182_vm1, %v181_v19 }
 0x18f   :  { %335 = dma.done.wait [#allocation4], 128  }
 0x190   :  { %336 = vsyncadd [#allocation4], 4294967168 }
 0x191   :  { %204 = vsyncpa [#allocation3], 1 }
 0x192   :  { %205 = vsyncpa [#allocation6], 1 }
 0x193   :  { %206 = vsyncpa [#allocation4], 1 }

</bundles_post_ra>
